<compile_context>
chip_gen: v7x
topology: tpu7x:2x2x1
jax: 0.10.0
libtpu: 0.0.40
codegen_flags: <defaults>
</compile_context>

<pallas_src>
import jax
import jax.numpy as jnp
from jax import lax
from jax.experimental import pallas as pl
from jax.experimental.pallas import tpu as pltpu


# --------------------------------------------------------------------------- #
# Kernels
# --------------------------------------------------------------------------- #
def proj_ln_gelu_kernel(x_ref, wproj_ref, ln_w_ref, ln_b_ref, g_ref):
    """g = GELU(LayerNorm(x @ w_proj)); one token tile per grid step."""
    # MXU takes native-dtype operands; accumulate in f32.
    h = jnp.dot(x_ref[...], wproj_ref[...],
                preferred_element_type=jnp.float32)                  # [tm, hidden]

    # LayerNorm(hidden), eps = 1e-5 (PyTorch default), affine.
    mean = jnp.mean(h, axis=-1, keepdims=True)
    cen = h - mean
    var = jnp.mean(cen * cen, axis=-1, keepdims=True)
    hn = cen * lax.rsqrt(var + 1e-5)
    hn = hn * ln_w_ref[...].astype(jnp.float32) + ln_b_ref[...].astype(jnp.float32)

    # GELU (exact / erf form, matching nn.GELU default).
    g = 0.5 * hn * (1.0 + lax.erf(hn * 0.7071067811865476))
    g_ref[...] = g.astype(g_ref.dtype)


def glu_ffn_kernel(g_ref, wgu_ref, wdown_ref, o_ref, acc_ref):
    """out = (silu(g @ w_gate) * (g @ w_up)) @ w_down, accumulated over ffn tiles."""
    j = pl.program_id(1)
    tn = wdown_ref.shape[0]

    # Fused gate/up matmul: the wgu column tile is [hidden, 2*tn] = [gate_j | up_j].
    gu = jnp.dot(g_ref[...], wgu_ref[...],
                 preferred_element_type=jnp.float32)                 # [tm, 2*tn]
    gate = gu[:, :tn]
    up = gu[:, tn:]
    inter = (gate * jax.nn.sigmoid(gate)) * up                       # silu(gate) * up

    partial = jnp.dot(inter.astype(wdown_ref.dtype), wdown_ref[...],
                      preferred_element_type=jnp.float32)            # [tm, hidden]

    @pl.when(j == 0)
    def _():
        acc_ref[...] = partial          # first ffn tile: direct store, no zero+RMW

    @pl.when(j > 0)
    def _():
        acc_ref[...] += partial

    @pl.when(j == pl.num_programs(1) - 1)
    def _():
        o_ref[...] = acc_ref[...].astype(o_ref.dtype)


# --------------------------------------------------------------------------- #
# Wrapper
# --------------------------------------------------------------------------- #
def _round_up(x, m):
    return (x + m - 1) // m * m


def _default_vmem_limit():
    """~85% of physical per-core VMEM (leaves headroom for compiler scratch):
       v7x (64 MiB) -> ~54 MiB, v5e/v6e (128 MiB) -> ~108 MiB."""
    try:
        cap = pltpu.get_tpu_info().vmem_capacity_bytes
        return min(int(cap * 0.85), 112 * 1024 * 1024)
    except Exception:
        return 64 * 1024 * 1024   # conservative: safe on every generation


def _glu_pallas_calls(x2, w_proj, ln_w2, ln_b2, w_gu, w_down, *,
                      tm, tn, ni, nj, hidden, out_dtype, vmem_limit_bytes,
                      single_buffer_invariants):
    in_features = x2.shape[1]
    tokens_p = x2.shape[0]

    if single_buffer_invariants:
        def inv_spec(shape):
            # Grid-invariant operand (constant index_map): single-buffer it.
            return pl.BlockSpec(shape, lambda i: (0, 0), pipeline_mode=pl.Buffered(1))
    else:
        def inv_spec(shape):
            return pl.BlockSpec(shape, lambda i: (0, 0))

    # ---- stage 1: g = GELU(LayerNorm(x @ w_proj)) -------------------------- #
    g = pl.pallas_call(
        proj_ln_gelu_kernel,
        out_shape=jax.ShapeDtypeStruct((tokens_p, hidden), out_dtype),
        grid_spec=pltpu.PrefetchScalarGridSpec(
            num_scalar_prefetch=0,
            grid=(ni,),
            in_specs=[
                pl.BlockSpec((tm, in_features), lambda i: (i, 0)),   # x tile
                inv_spec((in_features, hidden)),                     # w_proj (resident)
                inv_spec((1, hidden)),                               # ln weight
                inv_spec((1, hidden)),                               # ln bias
            ],
            out_specs=pl.BlockSpec((tm, hidden), lambda i: (i, 0)),
        ),
        compiler_params=pltpu.CompilerParams(
            dimension_semantics=("parallel",),
            vmem_limit_bytes=vmem_limit_bytes,
        ),
    )(x2, w_proj, ln_w2, ln_b2)

    # ---- stage 2: out = (silu(g @ Wg) * (g @ Wu)) @ Wd --------------------- #
    out = pl.pallas_call(
        glu_ffn_kernel,
        out_shape=jax.ShapeDtypeStruct((tokens_p, hidden), out_dtype),
        grid_spec=pltpu.PrefetchScalarGridSpec(
            num_scalar_prefetch=0,
            grid=(ni, nj),
            in_specs=[
                pl.BlockSpec((tm, hidden), lambda i, j: (i, 0)),      # g tile
                pl.BlockSpec((hidden, 2 * tn), lambda i, j: (0, j)),  # [gate_j | up_j]
                pl.BlockSpec((tn, hidden), lambda i, j: (j, 0)),      # w_down rows
            ],
            out_specs=pl.BlockSpec((tm, hidden), lambda i, j: (i, 0)),
            scratch_shapes=[pltpu.VMEM((tm, hidden), jnp.float32)],   # f32 accumulator
        ),
        compiler_params=pltpu.CompilerParams(
            dimension_semantics=("parallel", "arbitrary"),
            vmem_limit_bytes=vmem_limit_bytes,
        ),
    )(g, w_gu, w_down)
    return out


def glu_forward(x, w_proj, ln_w, ln_b, w_gate, w_up, w_down, *,
                tile_m=512, tile_n=512, vmem_limit_bytes=None):
    """x: [..., in_features]. Weights already transposed to [in, out]."""
    in_features = x.shape[-1]
    hidden = w_proj.shape[1]
    ffn = w_gate.shape[1]
    lead = x.shape[:-1]

    x2 = x.reshape(-1, in_features)
    tokens = x2.shape[0]

    # dtype-aware sublane rounding: 8 rows f32 / 16 bf16 / 32 int8.
    sub = 8 * max(1, 4 // jnp.dtype(x.dtype).itemsize)
    tm = min(tile_m, _round_up(tokens, sub))
    tn = min(tile_n, _round_up(ffn, 128))

    tokens_p = _round_up(tokens, tm)
    ffn_p = _round_up(ffn, tn)

    # Zero padding is mathematically inert: padded ffn columns/rows contribute 0;
    # padded token rows are sliced off below.
    if tokens_p != tokens:
        x2 = jnp.pad(x2, ((0, tokens_p - tokens), (0, 0)))
    if ffn_p != ffn:
        pad_n = ffn_p - ffn
        w_gate = jnp.pad(w_gate, ((0, 0), (0, pad_n)))
        w_up = jnp.pad(w_up, ((0, 0), (0, pad_n)))
        w_down = jnp.pad(w_down, ((0, pad_n), (0, 0)))

    ni = tokens_p // tm
    nj = ffn_p // tn

    # Fuse gate/up weights tile-wise: column block j of the fused operand is
    # [gate_cols_j | up_cols_j] -> one DMA stream / one MXU pass per ffn step.
    w_gu = jnp.concatenate(
        [w_gate.reshape(hidden, nj, tn), w_up.reshape(hidden, nj, tn)], axis=-1
    ).reshape(hidden, nj * 2 * tn)

    ln_w2 = ln_w.reshape(1, hidden)
    ln_b2 = ln_b.reshape(1, hidden)

    if vmem_limit_bytes is None:
        vmem_limit_bytes = _default_vmem_limit()

    kwargs = dict(tm=tm, tn=tn, ni=ni, nj=nj, hidden=hidden, out_dtype=x.dtype,
                  vmem_limit_bytes=vmem_limit_bytes)
    try:
        out = _glu_pallas_calls(x2, w_proj, ln_w2, ln_b2, w_gu, w_down,
                                single_buffer_invariants=True, **kwargs)
    except Exception:
        # Fallback for JAX versions that reject pipeline_mode=pl.Buffered(1);
        # identical math, default double-buffered specs.
        out = _glu_pallas_calls(x2, w_proj, ln_w2, ln_b2, w_gu, w_down,
                                single_buffer_invariants=False, **kwargs)

    out = out[:tokens]
    return out.reshape(*lead, hidden)


# --------------------------------------------------------------------------- #
# Pure-JAX reference (same math, same [in, out] weight layout)
# --------------------------------------------------------------------------- #
def reference_glu(x, w_proj, ln_w, ln_b, w_gate, w_up, w_down):
    h = x.astype(jnp.float32) @ w_proj.astype(jnp.float32)
    mean = jnp.mean(h, axis=-1, keepdims=True)
    var = jnp.mean((h - mean) ** 2, axis=-1, keepdims=True)
    hn = (h - mean) * lax.rsqrt(var + 1e-5) * ln_w.astype(jnp.float32) \
        + ln_b.astype(jnp.float32)
    g = 0.5 * hn * (1.0 + lax.erf(hn / jnp.sqrt(2.0)))
    gate = g @ w_gate.astype(jnp.float32)
    up = g @ w_up.astype(jnp.float32)
    inter = (gate * jax.nn.sigmoid(gate)) * up
    return (inter @ w_down.astype(jnp.float32)).astype(x.dtype)


if __name__ == "__main__":
    # Small (but lane-dense: all feature dims multiples of 128) synthetic config.
    batch, seq = 2, 8                 # 16 tokens total
    in_features = 256
    hidden_size = 128
    ffn_hidden_size = 512
    dtype = jnp.float32

    key = jax.random.PRNGKey(0)
    k = jax.random.split(key, 7)

    x = jax.random.normal(k[0], (batch, seq, in_features), dtype=dtype)

    # nn.Linear weight is [out, in]; we store the transposed [in, out] form.
    w_proj = (0.05 * jax.random.normal(k[1], (in_features, hidden_size))).astype(dtype)
    ln_w = (jnp.ones((hidden_size,))
            + 0.1 * jax.random.normal(k[2], (hidden_size,))).astype(dtype)
    ln_b = (0.1 * jax.random.normal(k[3], (hidden_size,))).astype(dtype)
    w_gate = (0.05 * jax.random.normal(k[4], (hidden_size, ffn_hidden_size))).astype(dtype)
    w_up = (0.05 * jax.random.normal(k[5], (hidden_size, ffn_hidden_size))).astype(dtype)
    w_down = (0.05 * jax.random.normal(k[6], (ffn_hidden_size, hidden_size))).astype(dtype)

    ref = reference_glu(x, w_proj, ln_w, ln_b, w_gate, w_up, w_down)

    # 1) Default (performance) tiling — single ffn step at these toy shapes.
    out = glu_forward(x, w_proj, ln_w, ln_b, w_gate, w_up, w_down)
    out = jax.block_until_ready(out)
    assert out.shape == (batch, seq, hidden_size), out.shape
    assert jnp.allclose(out, ref, atol=1e-4, rtol=1e-4), \
        f"max err = {jnp.max(jnp.abs(out - ref))}"

    # 2) Small explicit tiles — exercises the 2-D FFN grid (token tiles x ffn
    #    tiles), multi-tile proj stage and the f32 down-projection accumulator.
    out2 = glu_forward(x, w_proj, ln_w, ln_b, w_gate, w_up, w_down,
                       tile_m=8, tile_n=256)
    out2 = jax.block_until_ready(out2)
    assert jnp.allclose(out2, ref, atol=1e-4, rtol=1e-4), \
        f"max err (tiled) = {jnp.max(jnp.abs(out2 - ref))}"

    # 3) bf16 production path: bf16 MXU operands, f32 accumulation, bf16 g cache.
    to_bf16 = lambda a: a.astype(jnp.bfloat16)
    xb, wpb, lwb, lbb, wgb, wub, wdb = map(
        to_bf16, (x, w_proj, ln_w, ln_b, w_gate, w_up, w_down))
    ref_bf16 = reference_glu(xb, wpb, lwb, lbb, wgb, wub, wdb)
    out3 = glu_forward(xb, wpb, lwb, lbb, wgb, wub, wdb)
    out3 = jax.block_until_ready(out3)
    assert out3.dtype == jnp.bfloat16
    assert jnp.allclose(out3.astype(jnp.float32), ref_bf16.astype(jnp.float32),
                        atol=3e-2, rtol=3e-2), \
        f"max err (bf16) = {jnp.max(jnp.abs(out3.astype(jnp.float32) - ref_bf16.astype(jnp.float32)))}"

    print("KERNEL_OK")
</pallas_src>

<mosaic_0001>
module attributes {stable_mosaic.version = 11 : i64} {
  func.func @proj_ln_gelu_kernel(%arg0: i32, %arg1: memref<16x256xf32, #tpu.memory_space<vmem>>, %arg2: memref<256x128xf32, #tpu.memory_space<vmem>>, %arg3: memref<1x128xf32, #tpu.memory_space<vmem>>, %arg4: memref<1x128xf32, #tpu.memory_space<vmem>>, %arg5: memref<16x128xf32, #tpu.memory_space<vmem>>) attributes {dimension_semantics = [#tpu.dimension_semantics<parallel>], iteration_bounds = array<i64: 1>, scalar_prefetch = 0 : i64, scratch_operands = 0 : i64, tpu.core_type = #tpu.core_type<tc>, window_params = [{transform_indices = @transform_0, window_bounds = array<i64: 16, 256>}, {pipeline_mode = #tpu.pipeline_mode<synchronous>, transform_indices = @transform_1, window_bounds = array<i64: 256, 128>}, {pipeline_mode = #tpu.pipeline_mode<synchronous>, transform_indices = @transform_2, window_bounds = array<i64: 1, 128>}, {pipeline_mode = #tpu.pipeline_mode<synchronous>, transform_indices = @transform_3, window_bounds = array<i64: 1, 128>}, {transform_indices = @transform_4, window_bounds = array<i64: 16, 128>}]} {
    %c0 = arith.constant 0 : index
    %c0_0 = arith.constant 0 : index
    %0 = vector.load %arg1[%c0, %c0_0] : memref<16x256xf32, #tpu.memory_space<vmem>>, vector<16x256xf32>
    %c0_1 = arith.constant 0 : index
    %c0_2 = arith.constant 0 : index
    %1 = vector.load %arg2[%c0_1, %c0_2] : memref<256x128xf32, #tpu.memory_space<vmem>>, vector<256x128xf32>
    %cst = arith.constant dense<0.000000e+00> : vector<16x128xf32>
    %2 = tpu.matmul %0, %1, %cst {dimension_numbers = #tpu.dot_dimension_numbers<[1], [0], [0], [1], [0, 0, 1, 1], [], []>} : vector<16x256xf32>, vector<256x128xf32>, vector<16x128xf32> -> vector<16x128xf32>
    %cst_3 = arith.constant dense<0.000000e+00> : vector<16xf32>
    %3 = vector.multi_reduction <add>, %2, %cst_3 [1] : vector<16x128xf32> to vector<16xf32>
    %4 = vector.shape_cast %3 : vector<16xf32> to vector<16x1xf32>
    %cst_4 = arith.constant 1.280000e+02 : f32
    %5 = vector.broadcast %cst_4 : f32 to vector<16x1xf32>
    %6 = arith.divf %4, %5 : vector<16x1xf32>
    %7 = vector.broadcast %6 : vector<16x1xf32> to vector<16x128xf32>
    %8 = arith.subf %2, %7 : vector<16x128xf32>
    %9 = arith.mulf %8, %8 : vector<16x128xf32>
    %cst_5 = arith.constant dense<0.000000e+00> : vector<16xf32>
    %10 = vector.multi_reduction <add>, %9, %cst_5 [1] : vector<16x128xf32> to vector<16xf32>
    %11 = vector.shape_cast %10 : vector<16xf32> to vector<16x1xf32>
    %cst_6 = arith.constant 1.280000e+02 : f32
    %12 = vector.broadcast %cst_6 : f32 to vector<16x1xf32>
    %13 = arith.divf %11, %12 : vector<16x1xf32>
    %cst_7 = arith.constant 9.99999974E-6 : f32
    %14 = vector.broadcast %cst_7 : f32 to vector<16x1xf32>
    %15 = arith.addf %13, %14 : vector<16x1xf32>
    %16 = math.rsqrt %15 : vector<16x1xf32>
    %17 = vector.broadcast %16 : vector<16x1xf32> to vector<16x128xf32>
    %18 = arith.mulf %8, %17 : vector<16x128xf32>
    %c0_8 = arith.constant 0 : index
    %c0_9 = arith.constant 0 : index
    %19 = vector.load %arg3[%c0_8, %c0_9] : memref<1x128xf32, #tpu.memory_space<vmem>>, vector<1x128xf32>
    %20 = vector.broadcast %19 : vector<1x128xf32> to vector<16x128xf32>
    %21 = arith.mulf %18, %20 : vector<16x128xf32>
    %c0_10 = arith.constant 0 : index
    %c0_11 = arith.constant 0 : index
    %22 = vector.load %arg4[%c0_10, %c0_11] : memref<1x128xf32, #tpu.memory_space<vmem>>, vector<1x128xf32>
    %23 = vector.broadcast %22 : vector<1x128xf32> to vector<16x128xf32>
    %24 = arith.addf %21, %23 : vector<16x128xf32>
    %cst_12 = arith.constant 5.000000e-01 : f32
    %25 = vector.broadcast %cst_12 : f32 to vector<16x128xf32>
    %26 = arith.mulf %25, %24 : vector<16x128xf32>
    %cst_13 = arith.constant 0.707106769 : f32
    %27 = vector.broadcast %cst_13 : f32 to vector<16x128xf32>
    %28 = arith.mulf %24, %27 : vector<16x128xf32>
    %29 = math.erf %28 : vector<16x128xf32>
    %cst_14 = arith.constant 1.000000e+00 : f32
    %30 = vector.broadcast %cst_14 : f32 to vector<16x128xf32>
    %31 = arith.addf %30, %29 : vector<16x128xf32>
    %32 = arith.mulf %26, %31 : vector<16x128xf32>
    %c0_15 = arith.constant 0 : index
    %c0_16 = arith.constant 0 : index
    %33 = vector.load %arg5[%c0_15, %c0_16] : memref<16x128xf32, #tpu.memory_space<vmem>>, vector<16x128xf32>
    tpu.vector_store %arg5[%c0_15, %c0_16], %32 {strides = array<i32>} : memref<16x128xf32, #tpu.memory_space<vmem>>, vector<16x128xf32>,
    return
  }
  func.func @transform_0(%arg0: i32) -> (i32, i32) {
    %c0_i32 = arith.constant 0 : i32
    %c0_i32_0 = arith.constant 0 : i32
    return %arg0, %c0_i32 : i32, i32
  }
  func.func @transform_1(%arg0: i32) -> (i32, i32) {
    %c0_i32 = arith.constant 0 : i32
    %c0_i32_0 = arith.constant 0 : i32
    %c0_i32_1 = arith.constant 0 : i32
    return %c0_i32, %c0_i32_0 : i32, i32
  }
  func.func @transform_2(%arg0: i32) -> (i32, i32) {
    %c0_i32 = arith.constant 0 : i32
    %c0_i32_0 = arith.constant 0 : i32
    %c0_i32_1 = arith.constant 0 : i32
    return %c0_i32, %c0_i32_0 : i32, i32
  }
  func.func @transform_3(%arg0: i32) -> (i32, i32) {
    %c0_i32 = arith.constant 0 : i32
    %c0_i32_0 = arith.constant 0 : i32
    %c0_i32_1 = arith.constant 0 : i32
    return %c0_i32, %c0_i32_0 : i32, i32
  }
  func.func @transform_4(%arg0: i32) -> (i32, i32) {
    %c0_i32 = arith.constant 0 : i32
    %c0_i32_0 = arith.constant 0 : i32
    return %arg0, %c0_i32 : i32, i32
  }
}

module attributes {stable_mosaic.version = 11 : i64} {
  func.func @proj_ln_gelu_kernel(%arg0: i32, %arg1: memref<16x256xf32, #tpu.memory_space<vmem>>, %arg2: memref<256x128xf32, #tpu.memory_space<vmem>>, %arg3: memref<1x128xf32, #tpu.memory_space<vmem>>, %arg4: memref<1x128xf32, #tpu.memory_space<vmem>>, %arg5: memref<16x128xf32, #tpu.memory_space<vmem>>) attributes {dimension_semantics = [#tpu.dimension_semantics<parallel>], iteration_bounds = array<i64: 1>, scalar_prefetch = 0 : i64, scratch_operands = 0 : i64, tpu.core_type = #tpu.core_type<tc>, window_params = [{transform_indices = @transform_0, window_bounds = array<i64: 16, 256>}, {pipeline_mode = #tpu.pipeline_mode<synchronous>, transform_indices = @transform_1, window_bounds = array<i64: 256, 128>}, {pipeline_mode = #tpu.pipeline_mode<synchronous>, transform_indices = @transform_2, window_bounds = array<i64: 1, 128>}, {pipeline_mode = #tpu.pipeline_mode<synchronous>, transform_indices = @transform_3, window_bounds = array<i64: 1, 128>}, {transform_indices = @transform_4, window_bounds = array<i64: 16, 128>}]} {
    %c0 = arith.constant 0 : index
    %c0_0 = arith.constant 0 : index
    %0 = vector.load %arg1[%c0, %c0_0] : memref<16x256xf32, #tpu.memory_space<vmem>>, vector<16x256xf32>
    %c0_1 = arith.constant 0 : index
    %c0_2 = arith.constant 0 : index
    %1 = vector.load %arg2[%c0_1, %c0_2] : memref<256x128xf32, #tpu.memory_space<vmem>>, vector<256x128xf32>
    %cst = arith.constant dense<0.000000e+00> : vector<16x128xf32>
    %2 = tpu.matmul %0, %1, %cst {dimension_numbers = #tpu.dot_dimension_numbers<[1], [0], [0], [1], [0, 0, 1, 1], [], []>} : vector<16x256xf32>, vector<256x128xf32>, vector<16x128xf32> -> vector<16x128xf32>
    %cst_3 = arith.constant dense<0.000000e+00> : vector<16xf32>
    %3 = vector.multi_reduction <add>, %2, %cst_3 [1] : vector<16x128xf32> to vector<16xf32>
    %4 = vector.shape_cast %3 : vector<16xf32> to vector<16x1xf32>
    %cst_4 = arith.constant 1.280000e+02 : f32
    %5 = vector.broadcast %cst_4 : f32 to vector<16x1xf32>
    %6 = arith.divf %4, %5 : vector<16x1xf32>
    %7 = vector.broadcast %6 : vector<16x1xf32> to vector<16x128xf32>
    %8 = arith.subf %2, %7 : vector<16x128xf32>
    %9 = arith.mulf %8, %8 : vector<16x128xf32>
    %cst_5 = arith.constant dense<0.000000e+00> : vector<16xf32>
    %10 = vector.multi_reduction <add>, %9, %cst_5 [1] : vector<16x128xf32> to vector<16xf32>
    %11 = vector.shape_cast %10 : vector<16xf32> to vector<16x1xf32>
    %cst_6 = arith.constant 1.280000e+02 : f32
    %12 = vector.broadcast %cst_6 : f32 to vector<16x1xf32>
    %13 = arith.divf %11, %12 : vector<16x1xf32>
    %cst_7 = arith.constant 9.99999974E-6 : f32
    %14 = vector.broadcast %cst_7 : f32 to vector<16x1xf32>
    %15 = arith.addf %13, %14 : vector<16x1xf32>
    %16 = math.rsqrt %15 : vector<16x1xf32>
    %17 = vector.broadcast %16 : vector<16x1xf32> to vector<16x128xf32>
    %18 = arith.mulf %8, %17 : vector<16x128xf32>
    %c0_8 = arith.constant 0 : index
    %c0_9 = arith.constant 0 : index
    %19 = vector.load %arg3[%c0_8, %c0_9] : memref<1x128xf32, #tpu.memory_space<vmem>>, vector<1x128xf32>
    %20 = vector.broadcast %19 : vector<1x128xf32> to vector<16x128xf32>
    %21 = arith.mulf %18, %20 : vector<16x128xf32>
    %c0_10 = arith.constant 0 : index
    %c0_11 = arith.constant 0 : index
    %22 = vector.load %arg4[%c0_10, %c0_11] : memref<1x128xf32, #tpu.memory_space<vmem>>, vector<1x128xf32>
    %23 = vector.broadcast %22 : vector<1x128xf32> to vector<16x128xf32>
    %24 = arith.addf %21, %23 : vector<16x128xf32>
    %cst_12 = arith.constant 5.000000e-01 : f32
    %25 = vector.broadcast %cst_12 : f32 to vector<16x128xf32>
    %26 = arith.mulf %25, %24 : vector<16x128xf32>
    %cst_13 = arith.constant 0.707106769 : f32
    %27 = vector.broadcast %cst_13 : f32 to vector<16x128xf32>
    %28 = arith.mulf %24, %27 : vector<16x128xf32>
    %29 = math.erf %28 : vector<16x128xf32>
    %cst_14 = arith.constant 1.000000e+00 : f32
    %30 = vector.broadcast %cst_14 : f32 to vector<16x128xf32>
    %31 = arith.addf %30, %29 : vector<16x128xf32>
    %32 = arith.mulf %26, %31 : vector<16x128xf32>
    %c0_15 = arith.constant 0 : index
    %c0_16 = arith.constant 0 : index
    %33 = vector.load %arg5[%c0_15, %c0_16] : memref<16x128xf32, #tpu.memory_space<vmem>>, vector<16x128xf32>
    tpu.vector_store %arg5[%c0_15, %c0_16], %32 {strides = array<i32>} : memref<16x128xf32, #tpu.memory_space<vmem>>, vector<16x128xf32>,
    return
  }
  func.func @transform_0(%arg0: i32) -> (i32, i32) {
    %c0_i32 = arith.constant 0 : i32
    %c0_i32_0 = arith.constant 0 : i32
    return %arg0, %c0_i32 : i32, i32
  }
  func.func @transform_1(%arg0: i32) -> (i32, i32) {
    %c0_i32 = arith.constant 0 : i32
    %c0_i32_0 = arith.constant 0 : i32
    %c0_i32_1 = arith.constant 0 : i32
    return %c0_i32, %c0_i32_0 : i32, i32
  }
  func.func @transform_2(%arg0: i32) -> (i32, i32) {
    %c0_i32 = arith.constant 0 : i32
    %c0_i32_0 = arith.constant 0 : i32
    %c0_i32_1 = arith.constant 0 : i32
    return %c0_i32, %c0_i32_0 : i32, i32
  }
  func.func @transform_3(%arg0: i32) -> (i32, i32) {
    %c0_i32 = arith.constant 0 : i32
    %c0_i32_0 = arith.constant 0 : i32
    %c0_i32_1 = arith.constant 0 : i32
    return %c0_i32, %c0_i32_0 : i32, i32
  }
  func.func @transform_4(%arg0: i32) -> (i32, i32) {
    %c0_i32 = arith.constant 0 : i32
    %c0_i32_0 = arith.constant 0 : i32
    return %arg0, %c0_i32 : i32, i32
  }
}

</mosaic_0001>

<bundles_post_ra>
// kernel: tpu_custom_call.1
= control target key start
LH: loop header
LB: loop body
LE: loop exit
PB: predicated region body
PF: predicated region fallthrough
CT: control target
= control target key end

     0   :  { %9 = vsyncpa [#allocation3], 0  ;;  %s575_s0 = inlined_call_operand.hbm [shape: f32[16,256], index: 0, kind: input, shape index: {}]   ;;  %s576_s1 = inlined_call_operand.hbm [shape: f32[256,128], index: 1, kind: input, shape index: {}]   ;;  %s577_s2 = inlined_call_operand.hbm [shape: f32[1,128], index: 2, kind: input, shape index: {}]   ;;  %s578_s3 = inlined_call_operand.hbm [shape: f32[1,128], index: 3, kind: input, shape index: {}]   ;;  %s579_s4 = inlined_call_operand.hbm [shape: f32[16,128], index: 4, kind: output, shape index: {}]  }
   0x1   :  { %10 = vsyncpa [#allocation6], 0 }
   0x2   :  { %11 = vsyncpa [#allocation9], 0 }
   0x3   :  { %12 = vsyncpa [#allocation4], 0  ;;  %s475_s15 = smov [#allocation5]   ;;  %s357_s19 = scalar_lea.hbm %s576_s1, 4096 }
   0x4   :  { %s30_s16 = sshll.u32 %s475_s15, 4  ;;  %p358_p0 = scmp.ne.s32.totalorder %s576_s1, %s357_s19  ;;  %s31_s16 = int_to_ptr.vmem [resolvable:$true] %s30_s16 }
   0x5   :  { %p361_p1 = scmp.lt.u32.totalorder %s357_s19, %s576_s1 }
   0x7   :  { %p363_p2 = pnand %p361_p1, %p358_p0 }
   0x9   :  { %366 = shalt.err (!%p363_p2)
}
   0xa   :  { %s367_s24 = scalar_lea.vmem %s31_s16, 4096  ;;  %p372_p4 = scmp.lt.s32.totalorder %s31_s16, %s31_s16 }
   0xb   :  { %p368_p3 = scmp.ne.s32.totalorder %s31_s16, %s367_s24  ;;  %p373_p5 = scmp.lt.s32.totalorder %s367_s24, %s367_s24 }
   0xd   :  { %p374_p6 = por %p373_p5, %p372_p4 }
   0xf   :  { %p375_p7 = pnand %p374_p6, %p368_p3 }
  0x11   :  { %378 = shalt.err (!%p375_p7)
}
  0x12   :  { %s476_s25 = smov 128   ;;  %s477_s26 = smov 8  }
  0x13   :  { %36 = dma.hbm_to_vmem [thread:$0]  %s576_s1, 4096, %s31_s16, [#allocation6], %s476_s25, %s476_s25, %s477_s26  }
  0x14   :  { %s478_s29 = smov [#allocation2]   ;;  %s379_s7 = scalar_lea.hbm %s575_s0, 512 }
  0x15   :  { %s18_s30 = sshll.u32 %s478_s29, 4  ;;  %p380_p8 = scmp.ne.s32.totalorder %s575_s0, %s379_s7  ;;  %s19_s30 = int_to_ptr.vmem [resolvable:$true] %s18_s30 }
  0x16   :  { %p383_p9 = scmp.lt.u32.totalorder %s379_s7, %s575_s0 }
  0x18   :  { %p385_p10 = pnand %p383_p9, %p380_p8 }
  0x1a   :  { %388 = shalt.err (!%p385_p10)
}
  0x1b   :  { %s389_s12 = scalar_lea.vmem %s19_s30, 512  ;;  %p394_p12 = scmp.lt.s32.totalorder %s19_s30, %s19_s30 }
  0x1c   :  { %p390_p11 = scmp.ne.s32.totalorder %s19_s30, %s389_s12  ;;  %p395_p13 = scmp.lt.s32.totalorder %s389_s12, %s389_s12 }
  0x1e   :  { %p396_p0 = por %p395_p13, %p394_p12 }
  0x20   :  { %p397_p1 = pnand %p396_p0, %p390_p11 }
  0x22   :  { %400 = shalt.err (!%p397_p1)
}
  0x23   :  { %s479_s1 = smov 256   ;;  %s480_s13 = smov 16  }
  0x24   :  { %24 = dma.hbm_to_vmem [thread:$0]  %s575_s0, 512, %s19_s30, [#allocation3], %s479_s1, %s479_s1, %s480_s13  }
  0x25   :  { %s481_s16 = smov [#allocation7]   ;;  %s482_s18 = smov [#allocation8]  }
  0x26   :  { %s43_s17 = sshll.u32 %s481_s16, 4  ;;  %s53_s19 = sshll.u32 %s482_s18, 4  ;;  %s44_s17 = int_to_ptr.vmem [resolvable:$true] %s43_s17  ;;  %s54_s19 = int_to_ptr.vmem [resolvable:$true] %s53_s19 }
  0x27   :  { %s401_s22 = scalar_lea.hbm %s577_s2, 16 }
  0x28   :  { %p402_p2 = scmp.ne.s32.totalorder %s577_s2, %s401_s22  ;;  %p405_p3 = scmp.lt.u32.totalorder %s401_s22, %s577_s2 }
  0x2a   :  { %p407_p4 = pnand %p405_p3, %p402_p2 }
  0x2c   :  { %410 = shalt.err (!%p407_p4)
}
  0x2d   :  { %s411_s0 = scalar_lea.vmem %s44_s17, 16  ;;  %s415_s29 = scalar_lea.vmem %s44_s17, 32 }
  0x2e   :  { %p412_p5 = scmp.ne.s32.totalorder %s44_s17, %s411_s0  ;;  %p416_p6 = scmp.lt.s32.totalorder %s44_s17, %s44_s17 }
  0x2f   :  { %p417_p7 = scmp.lt.s32.totalorder %s415_s29, %s411_s0 }
  0x31   :  { %p418_p8 = por %p417_p7, %p416_p6 }
  0x33   :  { %p419_p9 = pnand %p418_p8, %p412_p5 }
  0x35   :  { %422 = shalt.err (!%p419_p9)
}
  0x36   :  { %46 = dma.hbm_to_vmem [thread:$0]  %s577_s2, 16, %s44_s17, [#allocation6]  }
  0x37   :  { %s423_s8 = scalar_lea.hbm %s578_s3, 16 }
  0x38   :  { %p424_p10 = scmp.ne.s32.totalorder %s578_s3, %s423_s8  ;;  %p427_p11 = scmp.lt.u32.totalorder %s423_s8, %s578_s3 }
  0x3a   :  { %p429_p12 = pnand %p427_p11, %p424_p10 }
  0x3c   :  { %432 = shalt.err (!%p429_p12)
}
  0x3d   :  { %s433_s1 = scalar_lea.vmem %s54_s19, 16  ;;  %s437_s13 = scalar_lea.vmem %s54_s19, 32 }
  0x3e   :  { %p434_p13 = scmp.ne.s32.totalorder %s54_s19, %s433_s1  ;;  %p438_p0 = scmp.lt.s32.totalorder %s54_s19, %s54_s19 }
  0x3f   :  { %p439_p1 = scmp.lt.s32.totalorder %s437_s13, %s433_s1 }
  0x41   :  { %p440_p2 = por %p439_p1, %p438_p0 }
  0x43   :  { %p441_p3 = pnand %p440_p2, %p434_p13 }
  0x45   :  { %444 = shalt.err (!%p441_p3)
}
  0x46   :  { %56 = dma.hbm_to_vmem [thread:$0]  %s578_s3, 16, %s54_s19, [#allocation9]  }
  0x47   :  { %467 = dma.done.wait [#allocation3], 512  }
  0x48   :  { %468 = vsyncadd [#allocation3], 4294966784 }
  0x49   :  { %469 = dma.done.wait [#allocation6], 4112  }
  0x4a   :  { %470 = vsyncadd [#allocation6], 4294963184 }
  0x4b   :  { %471 = dma.done.wait [#allocation9], 16  }
  0x4c   :  { %472 = vsyncadd [#allocation9], 4294967280  ;;  %v89_v0 = vld [vmem:[#allocation5 + $0x80] sm:$0xff]  ;;  %v90_v1 = vld [vmem:[#allocation5 + $0x88] sm:$0xff]  ;;  %s483_s3 = smov [#allocation10]  }
  0x4d   :  { %v73_v2 = vld [vmem:[#allocation5] sm:$0xff]  ;;  %v292_v3 = vpack.c.bf16 %v90_v1, %v89_v0  ;;  %v74_v4 = vld [vmem:[#allocation5 + $0x8] sm:$0xff]  ;;  %v91_v5 = vld [vmem:[#allocation5 + $0x90] sm:$0xff]  ;;  %s238_s15 = sshll.u32 %s483_s3, 4  ;;  %s239_s15 = int_to_ptr.vmem [resolvable:$true] %s238_s15 }
  0x4e   :  { %v92_v6 = vld [vmem:[#allocation5 + $0x98] sm:$0xff]  ;;  %v294_v7 = vpack.c.bf16 %v74_v4, %v73_v2  ;;  %v75_v9 = vld [vmem:[#allocation5 + $0x10] sm:$0xff]  ;;  %v93_v11 = vld [vmem:[#allocation5 + $0xa0] sm:$0xff]  ;;  %s445_s16 = scalar_lea.vmem %s239_s15, 256  ;;  %p450_p5 = scmp.lt.s32.totalorder %s239_s15, %s239_s15 }
  0x4f   :  { %v296_v8 = vpack.c.bf16 %v92_v6, %v91_v5  ;;  %v76_v10 = vld [vmem:[#allocation5 + $0x18] sm:$0xff]  ;;  %293 = vmatprep.subr.bf16.mxu0 %v292_v3  ;;  %324 = vmatprep.subr.bf16.mxu1 %v292_v3  ;;  %v94_v12 = vld [vmem:[#allocation5 + $0xa8] sm:$0xff]  ;;  %v77_v15 = vld [vmem:[#allocation5 + $0x20] sm:$0xff]  ;;  %p446_p4 = scmp.ne.s32.totalorder %s239_s15, %s445_s16  ;;  %p451_p6 = scmp.lt.s32.totalorder %s445_s16, %s445_s16 }
  0x50   :  { %295 = vmatpush3.bf16.msra.mxu0 %v294_v7  ;;  %332 = vmatpush3.bf16.msra.mxu1 %v294_v7  ;;  %v298_v13 = vpack.c.bf16 %v76_v10, %v75_v9  ;;  %v300_v14 = vpack.c.bf16 %v94_v12, %v93_v11  ;;  %v78_v16 = vld [vmem:[#allocation5 + $0x28] sm:$0xff]  ;;  %v95_v17 = vld [vmem:[#allocation5 + $0xb0] sm:$0xff]  ;;  %v96_v18 = vld [vmem:[#allocation5 + $0xb8] sm:$0xff] }
  0x51   :  { %297 = vmatprep.subr.bf16.mxu0 %v296_v8  ;;  %325 = vmatprep.subr.bf16.mxu1 %v296_v8  ;;  %v302_v19 = vpack.c.bf16 %v78_v16, %v77_v15  ;;  %v304_v20 = vpack.c.bf16 %v96_v18, %v95_v17  ;;  %v79_v21 = vld [vmem:[#allocation5 + $0x30] sm:$0xff]  ;;  %v80_v22 = vld [vmem:[#allocation5 + $0x38] sm:$0xff]  ;;  %v97_v23 = vld [vmem:[#allocation5 + $0xc0] sm:$0xff]  ;;  %p452_p7 = por %p451_p6, %p450_p5 }
  0x52   :  { %v98_v24 = vld [vmem:[#allocation5 + $0xc8] sm:$0xff]  ;;  %v72_v26 = vld [vmem:[#allocation2 + $0x18] sm:$0xff]  ;;  %v306_v27 = vpack.c.bf16 %v80_v22, %v79_v21  ;;  %v81_v29 = vld [vmem:[#allocation5 + $0x40] sm:$0xff] }
  0x53   :  { %v70_v25 = vld [vmem:[#allocation2 + $0x8] sm:$0xff]  ;;  %v308_v28 = vpack.c.bf16 %v98_v24, %v97_v23  ;;  %v99_v31 = vld [vmem:[#allocation5 + $0xd0] sm:$0xff]  ;;  %v100_v32 = vld [vmem:[#allocation5 + $0xd8] sm:$0xff]  ;;  %174 = vmatprep.mubr.f32.mxu1 %v72_v26  ;;  %p453_p8 = pnand %p452_p7, %p446_p4 }
  0x54   :  { %299 = vmatpush3.bf16.msra.mxu0 %v298_v13  ;;  %333 = vmatpush3.bf16.msra.mxu1 %v298_v13  ;;  %v82_v30 = vld [vmem:[#allocation5 + $0x48] sm:$0xff]  ;;  %v312_v34 = vpack.c.bf16 %v100_v32, %v99_v31  ;;  %v83_v35 = vld [vmem:[#allocation5 + $0x50] sm:$0xff]  ;;  %v84_v36 = vld [vmem:[#allocation5 + $0x58] sm:$0xff] }
  0x55   :  { %301 = vmatprep.subr.bf16.mxu0 %v300_v14  ;;  %326 = vmatprep.subr.bf16.mxu1 %v300_v14  ;;  %v310_v33 = vpack.c.bf16 %v82_v30, %v81_v29  ;;  %v101_v37 = vld [vmem:[#allocation5 + $0xe0] sm:$0xff]  ;;  %v102_v38 = vld [vmem:[#allocation5 + $0xe8] sm:$0xff]  ;;  %v314_v39 = vpack.c.bf16 %v84_v36, %v83_v35  ;;  %v103_v43 = vld [vmem:[#allocation5 + $0xf0] sm:$0xff] }
  0x56   :  { %169 = vmatprep.mubr.f32.mxu0 %v70_v25  ;;  %v316_v40 = vpack.c.bf16 %v102_v38, %v101_v37  ;;  %v85_v41 = vld [vmem:[#allocation5 + $0x60] sm:$0xff]  ;;  %v86_v42 = vld [vmem:[#allocation5 + $0x68] sm:$0xff]  ;;  %v104_v44 = vld [vmem:[#allocation5 + $0xf8] sm:$0xff] }
  0x57   :  { %v318_v45 = vpack.c.bf16 %v86_v42, %v85_v41  ;;  %v320_v46 = vpack.c.bf16 %v104_v44, %v103_v43  ;;  %v87_v47 = vld [vmem:[#allocation5 + $0x70] sm:$0xff]  ;;  %v88_v48 = vld [vmem:[#allocation5 + $0x78] sm:$0xff]  ;;  %v69_v50 = vld [vmem:[#allocation2] sm:$0xff] }
  0x58   :  { %303 = vmatpush3.bf16.msra.mxu0 %v302_v19  ;;  %334 = vmatpush3.bf16.msra.mxu1 %v302_v19  ;;  %v322_v49 = vpack.c.bf16 %v88_v48, %v87_v47  ;;  %v71_v51 = vld [vmem:[#allocation2 + $0x10] sm:$0xff]  ;;  %v252_v9 = vld [vmem:[#allocation7] ss:$0 sm:$0xff]  ;;  %v253_v11 = vld [vmem:[#allocation8] ss:$0 sm:$0xff] }
  0x59   :  { %305 = vmatprep.subr.bf16.mxu0 %v304_v20  ;;  %327 = vmatprep.subr.bf16.mxu1 %v304_v20 }
  0x5c   :  { %307 = vmatpush3.bf16.msra.mxu0 %v306_v27  ;;  %335 = vmatpush3.bf16.msra.mxu1 %v306_v27 }
  0x5d   :  { %309 = vmatprep.subr.bf16.mxu0 %v308_v28  ;;  %328 = vmatprep.subr.bf16.mxu1 %v308_v28 }
  0x60   :  { %311 = vmatpush3.bf16.msra.mxu0 %v310_v33  ;;  %336 = vmatpush3.bf16.msra.mxu1 %v310_v33 }
  0x61   :  { %313 = vmatprep.subr.bf16.mxu0 %v312_v34  ;;  %329 = vmatprep.subr.bf16.mxu1 %v312_v34 }
  0x64   :  { %315 = vmatpush3.bf16.msra.mxu0 %v314_v39  ;;  %337 = vmatpush3.bf16.msra.mxu1 %v314_v39 }
  0x65   :  { %317 = vmatprep.subr.bf16.mxu0 %v316_v40  ;;  %330 = vmatprep.subr.bf16.mxu1 %v316_v40 }
  0x68   :  { %319 = vmatpush3.bf16.msra.mxu0 %v318_v45  ;;  %338 = vmatpush3.bf16.msra.mxu1 %v318_v45 }
  0x69   :  { %321 = vmatprep.subr.bf16.mxu0 %v320_v46  ;;  %331 = vmatprep.subr.bf16.mxu1 %v320_v46 }
  0x6c   :  { %323 = vmatpush3.bf16.msra.mxu0 %v322_v49  ;;  %339 = vmatpush3.bf16.msra.mxu1 %v322_v49 }
  0x6f   :  { %170 = vmatmul.mubr.f32.vlgmr.msra.gmra.mrb[0].mxu0 %v69_v50  ;;  %175 = vmatmul.mubr.f32.vlgmr.msra.gmra.mrb[0].mxu1 %v71_v51 }
 0x142   :  { %v286_v52 = vpop.f32.mrb[0].mxu0  ;;  %v289_v53 = vpop.f32.mrb[0].mxu1 }
 0x143   :  { %v287_v54 = vpop.f32.mrb[1].mxu0  ;;  %v290_v55 = vpop.f32.mrb[1].mxu1 }
 0x144   :  { %v288_v56 = vadd.f32 %v287_v54, %v286_v52  ;;  %v291_v57 = vadd.f32 %v290_v55, %v289_v53 }
 0x146   :  { %180 = vadd.xlane.f32.xlu0 %v288_v56 }
 0x14a   :  { %182 = vadd.xlane.f32.xlu0 %v291_v57 }
 0x1d3   :  { %v181_v58 = vpop.xlane.xlu0 %180 }
 0x1d4   :  { %v185_v59 = vmul.f32 0.0078125, %v181_v58 }
 0x1d6   :  { %v187_v60 = vsub.f32 %v288_v56, %v185_v59 }
 0x1d7   :  { %v183_v61 = vpop.xlane.xlu0 %182 }
 0x1d8   :  { %v186_v62 = vmul.f32 0.0078125, %v183_v61  ;;  %v189_v63 = vmul.f32 %v187_v60, %v187_v60 }
 0x1da   :  { %v188_v0 = vsub.f32 %v291_v57, %v186_v62  ;;  %191 = vadd.xlane.f32.xlu1 %v189_v63 }
 0x1dc   :  { %v190_v1 = vmul.f32 %v188_v0, %v188_v0 }
 0x1de   :  { %193 = vadd.xlane.f32.xlu1 %v190_v1 }
 0x267   :  { %v192_v2 = vpop.xlane.xlu1 %191 }
 0x268   :  { %v195_v3 = vmul.f32 0.0078125, %v192_v2 }
 0x26a   :  { %v197_v4 = vadd.f32 1e-05, %v195_v3 }
 0x26b   :  { %v194_v5 = vpop.xlane.xlu1 %193 }
 0x26c   :  { %349 = vrsqrt.f32 %v197_v4  ;;  %v196_v6 = vmul.f32 0.0078125, %v194_v5 }
 0x26e   :  { %v198_v7 = vadd.f32 1e-05, %v196_v6 }
 0x270   :  { %351 = vrsqrt.f32 %v198_v7 }
 0x276   :  { %v350_v8 = vpop.eup %349 }
 0x277   :  { %v201_v10 = vmul.f32 %v350_v8, %v187_v60 }
 0x279   :  { %v210_v12 = vmul.f32 %v252_v9, %v201_v10 }
 0x27a   :  { %v352_v13 = vpop.eup %351 }
 0x27b   :  { %v202_v14 = vmul.f32 %v352_v13, %v188_v0  ;;  %v219_v15 = vadd.f32 %v253_v11, %v210_v12 }
 0x27d   :  { %v211_v16 = vmul.f32 %v252_v9, %v202_v14  ;;  %v223_v17 = vmul.f32 0.70710677, %v219_v15  ;;  %v221_v21 = vmul.f32 0.5, %v219_v15 }
 0x27f   :  { %v220_v18 = vadd.f32 %v253_v11, %v211_v16  ;;  %353 = verf.f32 %v223_v17 }
 0x281   :  { %v224_v19 = vmul.f32 0.70710677, %v220_v18  ;;  %v222_v25 = vmul.f32 0.5, %v220_v18 }
 0x283   :  { %355 = verf.f32 %v224_v19 }
 0x289   :  { %v354_v20 = vpop.eup %353 }
 0x28a   :  { %v227_v22 = vadd.f32 1.0, %v354_v20 }
 0x28c   :  { %v229_v23 = vmul.f32 %v227_v22, %v221_v21 }
 0x28d   :  { %v356_v24 = vpop.eup %355 }
 0x28e   :  { %v228_v26 = vadd.f32 1.0, %v356_v24  ;;  %231 = vst [vmem:[#allocation10] sm:$0xff] %v229_v23 }
 0x290   :  { %v230_v27 = vmul.f32 %v228_v26, %v222_v25 }
 0x292   :  { %232 = vst [vmem:[#allocation10 + $0x8] sm:$0xff] %v230_v27 }
 0x293   :  { %456 = shalt.err (!%p453_p8)
}
 0x294   :  { %s457_s19 = scalar_lea.hbm %s579_s4, 256 }
 0x295   :  { %p458_p9 = scmp.ne.s32.totalorder %s579_s4, %s457_s19  ;;  %p461_p10 = scmp.lt.u32.totalorder %s457_s19, %s579_s4 }
 0x297   :  { %p463_p11 = pnand %p461_p10, %p458_p9 }
 0x299   :  { %466 = shalt.err (!%p463_p11)
}
 0x29a   :  { %244 = dma.vmem_to_hbm [thread:$0]  %s239_s15, 256, %s579_s4, [#allocation4], %s476_s25, %s476_s25, %s477_s26  }
 0x29b   :  { %473 = dma.done.wait [#allocation4], 256  }
 0x29c   :  { %474 = vsyncadd [#allocation4], 4294967040 }
 0x29d   :  { %248 = vsyncpa [#allocation3], 1 }
 0x29e   :  { %249 = vsyncpa [#allocation6], 1 }
 0x29f   :  { %250 = vsyncpa [#allocation9], 1 }
 0x2a0   :  { %251 = vsyncpa [#allocation4], 1 }

// kernel: tpu_custom_call.1
= control target key start
LH: loop header
LB: loop body
LE: loop exit
PB: predicated region body
PF: predicated region fallthrough
CT: control target
= control target key end

     0   :  { %9 = vsyncpa [#allocation3], 0  ;;  %s575_s0 = inlined_call_operand.hbm [shape: f32[16,256], index: 0, kind: input, shape index: {}]   ;;  %s576_s1 = inlined_call_operand.hbm [shape: f32[256,128], index: 1, kind: input, shape index: {}]   ;;  %s577_s2 = inlined_call_operand.hbm [shape: f32[1,128], index: 2, kind: input, shape index: {}]   ;;  %s578_s3 = inlined_call_operand.hbm [shape: f32[1,128], index: 3, kind: input, shape index: {}]   ;;  %s579_s4 = inlined_call_operand.hbm [shape: f32[16,128], index: 4, kind: output, shape index: {}]  }
   0x1   :  { %10 = vsyncpa [#allocation6], 0 }
   0x2   :  { %11 = vsyncpa [#allocation9], 0 }
   0x3   :  { %12 = vsyncpa [#allocation4], 0  ;;  %s475_s15 = smov [#allocation5]   ;;  %s357_s19 = scalar_lea.hbm %s576_s1, 4096 }
   0x4   :  { %s30_s16 = sshll.u32 %s475_s15, 4  ;;  %p358_p0 = scmp.ne.s32.totalorder %s576_s1, %s357_s19  ;;  %s31_s16 = int_to_ptr.vmem [resolvable:$true] %s30_s16 }
   0x5   :  { %p361_p1 = scmp.lt.u32.totalorder %s357_s19, %s576_s1 }
   0x7   :  { %p363_p2 = pnand %p361_p1, %p358_p0 }
   0x9   :  { %366 = shalt.err (!%p363_p2)
}
   0xa   :  { %s367_s24 = scalar_lea.vmem %s31_s16, 4096  ;;  %p372_p4 = scmp.lt.s32.totalorder %s31_s16, %s31_s16 }
   0xb   :  { %p368_p3 = scmp.ne.s32.totalorder %s31_s16, %s367_s24  ;;  %p373_p5 = scmp.lt.s32.totalorder %s367_s24, %s367_s24 }
   0xd   :  { %p374_p6 = por %p373_p5, %p372_p4 }
   0xf   :  { %p375_p7 = pnand %p374_p6, %p368_p3 }
  0x11   :  { %378 = shalt.err (!%p375_p7)
}
  0x12   :  { %s476_s25 = smov 128   ;;  %s477_s26 = smov 8  }
  0x13   :  { %36 = dma.hbm_to_vmem [thread:$0]  %s576_s1, 4096, %s31_s16, [#allocation6], %s476_s25, %s476_s25, %s477_s26  }
  0x14   :  { %s478_s29 = smov [#allocation2]   ;;  %s379_s7 = scalar_lea.hbm %s575_s0, 512 }
  0x15   :  { %s18_s30 = sshll.u32 %s478_s29, 4  ;;  %p380_p8 = scmp.ne.s32.totalorder %s575_s0, %s379_s7  ;;  %s19_s30 = int_to_ptr.vmem [resolvable:$true] %s18_s30 }
  0x16   :  { %p383_p9 = scmp.lt.u32.totalorder %s379_s7, %s575_s0 }
  0x18   :  { %p385_p10 = pnand %p383_p9, %p380_p8 }
  0x1a   :  { %388 = shalt.err (!%p385_p10)
}
  0x1b   :  { %s389_s12 = scalar_lea.vmem %s19_s30, 512  ;;  %p394_p12 = scmp.lt.s32.totalorder %s19_s30, %s19_s30 }
  0x1c   :  { %p390_p11 = scmp.ne.s32.totalorder %s19_s30, %s389_s12  ;;  %p395_p13 = scmp.lt.s32.totalorder %s389_s12, %s389_s12 }
  0x1e   :  { %p396_p0 = por %p395_p13, %p394_p12 }
  0x20   :  { %p397_p1 = pnand %p396_p0, %p390_p11 }
  0x22   :  { %400 = shalt.err (!%p397_p1)
}
  0x23   :  { %s479_s1 = smov 256   ;;  %s480_s13 = smov 16  }
  0x24   :  { %24 = dma.hbm_to_vmem [thread:$0]  %s575_s0, 512, %s19_s30, [#allocation3], %s479_s1, %s479_s1, %s480_s13  }
  0x25   :  { %s481_s16 = smov [#allocation7]   ;;  %s482_s18 = smov [#allocation8]  }
  0x26   :  { %s43_s17 = sshll.u32 %s481_s16, 4  ;;  %s53_s19 = sshll.u32 %s482_s18, 4  ;;  %s44_s17 = int_to_ptr.vmem [resolvable:$true] %s43_s17  ;;  %s54_s19 = int_to_ptr.vmem [resolvable:$true] %s53_s19 }
  0x27   :  { %s401_s22 = scalar_lea.hbm %s577_s2, 16 }
  0x28   :  { %p402_p2 = scmp.ne.s32.totalorder %s577_s2, %s401_s22  ;;  %p405_p3 = scmp.lt.u32.totalorder %s401_s22, %s577_s2 }
  0x2a   :  { %p407_p4 = pnand %p405_p3, %p402_p2 }
  0x2c   :  { %410 = shalt.err (!%p407_p4)
}
  0x2d   :  { %s411_s0 = scalar_lea.vmem %s44_s17, 16  ;;  %s415_s29 = scalar_lea.vmem %s44_s17, 32 }
  0x2e   :  { %p412_p5 = scmp.ne.s32.totalorder %s44_s17, %s411_s0  ;;  %p416_p6 = scmp.lt.s32.totalorder %s44_s17, %s44_s17 }
  0x2f   :  { %p417_p7 = scmp.lt.s32.totalorder %s415_s29, %s411_s0 }
  0x31   :  { %p418_p8 = por %p417_p7, %p416_p6 }
  0x33   :  { %p419_p9 = pnand %p418_p8, %p412_p5 }
  0x35   :  { %422 = shalt.err (!%p419_p9)
}
  0x36   :  { %46 = dma.hbm_to_vmem [thread:$0]  %s577_s2, 16, %s44_s17, [#allocation6]  }
  0x37   :  { %s423_s8 = scalar_lea.hbm %s578_s3, 16 }
  0x38   :  { %p424_p10 = scmp.ne.s32.totalorder %s578_s3, %s423_s8  ;;  %p427_p11 = scmp.lt.u32.totalorder %s423_s8, %s578_s3 }
  0x3a   :  { %p429_p12 = pnand %p427_p11, %p424_p10 }
  0x3c   :  { %432 = shalt.err (!%p429_p12)
}
  0x3d   :  { %s433_s1 = scalar_lea.vmem %s54_s19, 16  ;;  %s437_s13 = scalar_lea.vmem %s54_s19, 32 }
  0x3e   :  { %p434_p13 = scmp.ne.s32.totalorder %s54_s19, %s433_s1  ;;  %p438_p0 = scmp.lt.s32.totalorder %s54_s19, %s54_s19 }
  0x3f   :  { %p439_p1 = scmp.lt.s32.totalorder %s437_s13, %s433_s1 }
  0x41   :  { %p440_p2 = por %p439_p1, %p438_p0 }
  0x43   :  { %p441_p3 = pnand %p440_p2, %p434_p13 }
  0x45   :  { %444 = shalt.err (!%p441_p3)
}
  0x46   :  { %56 = dma.hbm_to_vmem [thread:$0]  %s578_s3, 16, %s54_s19, [#allocation9]  }
  0x47   :  { %467 = dma.done.wait [#allocation3], 512  }
  0x48   :  { %468 = vsyncadd [#allocation3], 4294966784 }
  0x49   :  { %469 = dma.done.wait [#allocation6], 4112  }
  0x4a   :  { %470 = vsyncadd [#allocation6], 4294963184 }
  0x4b   :  { %471 = dma.done.wait [#allocation9], 16  }
  0x4c   :  { %472 = vsyncadd [#allocation9], 4294967280  ;;  %v89_v0 = vld [vmem:[#allocation5 + $0x80] sm:$0xff]  ;;  %v90_v1 = vld [vmem:[#allocation5 + $0x88] sm:$0xff]  ;;  %s483_s3 = smov [#allocation10]  }
  0x4d   :  { %v73_v2 = vld [vmem:[#allocation5] sm:$0xff]  ;;  %v292_v3 = vpack.c.bf16 %v90_v1, %v89_v0  ;;  %v74_v4 = vld [vmem:[#allocation5 + $0x8] sm:$0xff]  ;;  %v91_v5 = vld [vmem:[#allocation5 + $0x90] sm:$0xff]  ;;  %s238_s15 = sshll.u32 %s483_s3, 4  ;;  %s239_s15 = int_to_ptr.vmem [resolvable:$true] %s238_s15 }
  0x4e   :  { %v92_v6 = vld [vmem:[#allocation5 + $0x98] sm:$0xff]  ;;  %v294_v7 = vpack.c.bf16 %v74_v4, %v73_v2  ;;  %v75_v9 = vld [vmem:[#allocation5 + $0x10] sm:$0xff]  ;;  %v93_v11 = vld [vmem:[#allocation5 + $0xa0] sm:$0xff]  ;;  %s445_s16 = scalar_lea.vmem %s239_s15, 256  ;;  %p450_p5 = scmp.lt.s32.totalorder %s239_s15, %s239_s15 }
  0x4f   :  { %v296_v8 = vpack.c.bf16 %v92_v6, %v91_v5  ;;  %v76_v10 = vld [vmem:[#allocation5 + $0x18] sm:$0xff]  ;;  %293 = vmatprep.subr.bf16.mxu0 %v292_v3  ;;  %324 = vmatprep.subr.bf16.mxu1 %v292_v3  ;;  %v94_v12 = vld [vmem:[#allocation5 + $0xa8] sm:$0xff]  ;;  %v77_v15 = vld [vmem:[#allocation5 + $0x20] sm:$0xff]  ;;  %p446_p4 = scmp.ne.s32.totalorder %s239_s15, %s445_s16  ;;  %p451_p6 = scmp.lt.s32.totalorder %s445_s16, %s445_s16 }
  0x50   :  { %295 = vmatpush3.bf16.msra.mxu0 %v294_v7  ;;  %332 = vmatpush3.bf16.msra.mxu1 %v294_v7  ;;  %v298_v13 = vpack.c.bf16 %v76_v10, %v75_v9  ;;  %v300_v14 = vpack.c.bf16 %v94_v12, %v93_v11  ;;  %v78_v16 = vld [vmem:[#allocation5 + $0x28] sm:$0xff]  ;;  %v95_v17 = vld [vmem:[#allocation5 + $0xb0] sm:$0xff]  ;;  %v96_v18 = vld [vmem:[#allocation5 + $0xb8] sm:$0xff] }
  0x51   :  { %297 = vmatprep.subr.bf16.mxu0 %v296_v8  ;;  %325 = vmatprep.subr.bf16.mxu1 %v296_v8  ;;  %v302_v19 = vpack.c.bf16 %v78_v16, %v77_v15  ;;  %v304_v20 = vpack.c.bf16 %v96_v18, %v95_v17  ;;  %v79_v21 = vld [vmem:[#allocation5 + $0x30] sm:$0xff]  ;;  %v80_v22 = vld [vmem:[#allocation5 + $0x38] sm:$0xff]  ;;  %v97_v23 = vld [vmem:[#allocation5 + $0xc0] sm:$0xff]  ;;  %p452_p7 = por %p451_p6, %p450_p5 }
  0x52   :  { %v98_v24 = vld [vmem:[#allocation5 + $0xc8] sm:$0xff]  ;;  %v72_v26 = vld [vmem:[#allocation2 + $0x18] sm:$0xff]  ;;  %v306_v27 = vpack.c.bf16 %v80_v22, %v79_v21  ;;  %v81_v29 = vld [vmem:[#allocation5 + $0x40] sm:$0xff] }
  0x53   :  { %v70_v25 = vld [vmem:[#allocation2 + $0x8] sm:$0xff]  ;;  %v308_v28 = vpack.c.bf16 %v98_v24, %v97_v23  ;;  %v99_v31 = vld [vmem:[#allocation5 + $0xd0] sm:$0xff]  ;;  %v100_v32 = vld [vmem:[#allocation5 + $0xd8] sm:$0xff]  ;;  %174 = vmatprep.mubr.f32.mxu1 %v72_v26  ;;  %p453_p8 = pnand %p452_p7, %p446_p4 }
  0x54   :  { %299 = vmatpush3.bf16.msra.mxu0 %v298_v13  ;;  %333 = vmatpush3.bf16.msra.mxu1 %v298_v13  ;;  %v82_v30 = vld [vmem:[#allocation5 + $0x48] sm:$0xff]  ;;  %v312_v34 = vpack.c.bf16 %v100_v32, %v99_v31  ;;  %v83_v35 = vld [vmem:[#allocation5 + $0x50] sm:$0xff]  ;;  %v84_v36 = vld [vmem:[#allocation5 + $0x58] sm:$0xff] }
  0x55   :  { %301 = vmatprep.subr.bf16.mxu0 %v300_v14  ;;  %326 = vmatprep.subr.bf16.mxu1 %v300_v14  ;;  %v310_v33 = vpack.c.bf16 %v82_v30, %v81_v29  ;;  %v101_v37 = vld [vmem:[#allocation5 + $0xe0] sm:$0xff]  ;;  %v102_v38 = vld [vmem:[#allocation5 + $0xe8] sm:$0xff]  ;;  %v314_v39 = vpack.c.bf16 %v84_v36, %v83_v35  ;;  %v103_v43 = vld [vmem:[#allocation5 + $0xf0] sm:$0xff] }
  0x56   :  { %169 = vmatprep.mubr.f32.mxu0 %v70_v25  ;;  %v316_v40 = vpack.c.bf16 %v102_v38, %v101_v37  ;;  %v85_v41 = vld [vmem:[#allocation5 + $0x60] sm:$0xff]  ;;  %v86_v42 = vld [vmem:[#allocation5 + $0x68] sm:$0xff]  ;;  %v104_v44 = vld [vmem:[#allocation5 + $0xf8] sm:$0xff] }
  0x57   :  { %v318_v45 = vpack.c.bf16 %v86_v42, %v85_v41  ;;  %v320_v46 = vpack.c.bf16 %v104_v44, %v103_v43  ;;  %v87_v47 = vld [vmem:[#allocation5 + $0x70] sm:$0xff]  ;;  %v88_v48 = vld [vmem:[#allocation5 + $0x78] sm:$0xff]  ;;  %v69_v50 = vld [vmem:[#allocation2] sm:$0xff] }
  0x58   :  { %303 = vmatpush3.bf16.msra.mxu0 %v302_v19  ;;  %334 = vmatpush3.bf16.msra.mxu1 %v302_v19  ;;  %v322_v49 = vpack.c.bf16 %v88_v48, %v87_v47  ;;  %v71_v51 = vld [vmem:[#allocation2 + $0x10] sm:$0xff]  ;;  %v252_v9 = vld [vmem:[#allocation7] ss:$0 sm:$0xff]  ;;  %v253_v11 = vld [vmem:[#allocation8] ss:$0 sm:$0xff] }
  0x59   :  { %305 = vmatprep.subr.bf16.mxu0 %v304_v20  ;;  %327 = vmatprep.subr.bf16.mxu1 %v304_v20 }
  0x5c   :  { %307 = vmatpush3.bf16.msra.mxu0 %v306_v27  ;;  %335 = vmatpush3.bf16.msra.mxu1 %v306_v27 }
  0x5d   :  { %309 = vmatprep.subr.bf16.mxu0 %v308_v28  ;;  %328 = vmatprep.subr.bf16.mxu1 %v308_v28 }
  0x60   :  { %311 = vmatpush3.bf16.msra.mxu0 %v310_v33  ;;  %336 = vmatpush3.bf16.msra.mxu1 %v310_v33 }
  0x61   :  { %313 = vmatprep.subr.bf16.mxu0 %v312_v34  ;;  %329 = vmatprep.subr.bf16.mxu1 %v312_v34 }
  0x64   :  { %315 = vmatpush3.bf16.msra.mxu0 %v314_v39  ;;  %337 = vmatpush3.bf16.msra.mxu1 %v314_v39 }
  0x65   :  { %317 = vmatprep.subr.bf16.mxu0 %v316_v40  ;;  %330 = vmatprep.subr.bf16.mxu1 %v316_v40 }
  0x68   :  { %319 = vmatpush3.bf16.msra.mxu0 %v318_v45  ;;  %338 = vmatpush3.bf16.msra.mxu1 %v318_v45 }
  0x69   :  { %321 = vmatprep.subr.bf16.mxu0 %v320_v46  ;;  %331 = vmatprep.subr.bf16.mxu1 %v320_v46 }
  0x6c   :  { %323 = vmatpush3.bf16.msra.mxu0 %v322_v49  ;;  %339 = vmatpush3.bf16.msra.mxu1 %v322_v49 }
  0x6f   :  { %170 = vmatmul.mubr.f32.vlgmr.msra.gmra.mrb[0].mxu0 %v69_v50  ;;  %175 = vmatmul.mubr.f32.vlgmr.msra.gmra.mrb[0].mxu1 %v71_v51 }
 0x142   :  { %v286_v52 = vpop.f32.mrb[0].mxu0  ;;  %v289_v53 = vpop.f32.mrb[0].mxu1 }
 0x143   :  { %v287_v54 = vpop.f32.mrb[1].mxu0  ;;  %v290_v55 = vpop.f32.mrb[1].mxu1 }
 0x144   :  { %v288_v56 = vadd.f32 %v287_v54, %v286_v52  ;;  %v291_v57 = vadd.f32 %v290_v55, %v289_v53 }
 0x146   :  { %180 = vadd.xlane.f32.xlu0 %v288_v56 }
 0x14a   :  { %182 = vadd.xlane.f32.xlu0 %v291_v57 }
 0x1d3   :  { %v181_v58 = vpop.xlane.xlu0 %180 }
 0x1d4   :  { %v185_v59 = vmul.f32 0.0078125, %v181_v58 }
 0x1d6   :  { %v187_v60 = vsub.f32 %v288_v56, %v185_v59 }
 0x1d7   :  { %v183_v61 = vpop.xlane.xlu0 %182 }
 0x1d8   :  { %v186_v62 = vmul.f32 0.0078125, %v183_v61  ;;  %v189_v63 = vmul.f32 %v187_v60, %v187_v60 }
 0x1da   :  { %v188_v0 = vsub.f32 %v291_v57, %v186_v62  ;;  %191 = vadd.xlane.f32.xlu1 %v189_v63 }
 0x1dc   :  { %v190_v1 = vmul.f32 %v188_v0, %v188_v0 }
 0x1de   :  { %193 = vadd.xlane.f32.xlu1 %v190_v1 }
 0x267   :  { %v192_v2 = vpop.xlane.xlu1 %191 }
 0x268   :  { %v195_v3 = vmul.f32 0.0078125, %v192_v2 }
 0x26a   :  { %v197_v4 = vadd.f32 1e-05, %v195_v3 }
 0x26b   :  { %v194_v5 = vpop.xlane.xlu1 %193 }
 0x26c   :  { %349 = vrsqrt.f32 %v197_v4  ;;  %v196_v6 = vmul.f32 0.0078125, %v194_v5 }
 0x26e   :  { %v198_v7 = vadd.f32 1e-05, %v196_v6 }
 0x270   :  { %351 = vrsqrt.f32 %v198_v7 }
 0x276   :  { %v350_v8 = vpop.eup %349 }
 0x277   :  { %v201_v10 = vmul.f32 %v350_v8, %v187_v60 }
 0x279   :  { %v210_v12 = vmul.f32 %v252_v9, %v201_v10 }
 0x27a   :  { %v352_v13 = vpop.eup %351 }
 0x27b   :  { %v202_v14 = vmul.f32 %v352_v13, %v188_v0  ;;  %v219_v15 = vadd.f32 %v253_v11, %v210_v12 }
 0x27d   :  { %v211_v16 = vmul.f32 %v252_v9, %v202_v14  ;;  %v223_v17 = vmul.f32 0.70710677, %v219_v15  ;;  %v221_v21 = vmul.f32 0.5, %v219_v15 }
 0x27f   :  { %v220_v18 = vadd.f32 %v253_v11, %v211_v16  ;;  %353 = verf.f32 %v223_v17 }
 0x281   :  { %v224_v19 = vmul.f32 0.70710677, %v220_v18  ;;  %v222_v25 = vmul.f32 0.5, %v220_v18 }
 0x283   :  { %355 = verf.f32 %v224_v19 }
 0x289   :  { %v354_v20 = vpop.eup %353 }
 0x28a   :  { %v227_v22 = vadd.f32 1.0, %v354_v20 }
 0x28c   :  { %v229_v23 = vmul.f32 %v227_v22, %v221_v21 }
 0x28d   :  { %v356_v24 = vpop.eup %355 }
 0x28e   :  { %v228_v26 = vadd.f32 1.0, %v356_v24  ;;  %231 = vst [vmem:[#allocation10] sm:$0xff] %v229_v23 }
 0x290   :  { %v230_v27 = vmul.f32 %v228_v26, %v222_v25 }
 0x292   :  { %232 = vst [vmem:[#allocation10 + $0x8] sm:$0xff] %v230_v27 }
 0x293   :  { %456 = shalt.err (!%p453_p8)
}
 0x294   :  { %s457_s19 = scalar_lea.hbm %s579_s4, 256 }
 0x295   :  { %p458_p9 = scmp.ne.s32.totalorder %s579_s4, %s457_s19  ;;  %p461_p10 = scmp.lt.u32.totalorder %s457_s19, %s579_s4 }
 0x297   :  { %p463_p11 = pnand %p461_p10, %p458_p9 }
 0x299   :  { %466 = shalt.err (!%p463_p11)
}
 0x29a   :  { %244 = dma.vmem_to_hbm [thread:$0]  %s239_s15, 256, %s579_s4, [#allocation4], %s476_s25, %s476_s25, %s477_s26  }
 0x29b   :  { %473 = dma.done.wait [#allocation4], 256  }
 0x29c   :  { %474 = vsyncadd [#allocation4], 4294967040 }
 0x29d   :  { %248 = vsyncpa [#allocation3], 1 }
 0x29e   :  { %249 = vsyncpa [#allocation6], 1 }
 0x29f   :  { %250 = vsyncpa [#allocation9], 1 }
 0x2a0   :  { %251 = vsyncpa [#allocation4], 1 }

</bundles_post_ra>
